<compile_context>
chip_gen: v7x
topology: tpu7x:2x2x1
jax: 0.10.0
libtpu: 0.0.40
codegen_flags: <defaults>
</compile_context>

<pallas_src>
import functools

import jax
import jax.numpy as jnp
import numpy as np
from jax import lax
from jax.experimental import pallas as pl
from jax.experimental.pallas import tpu as pltpu


def _flow_kernel(x_ref, w1_ref, b1_ref, w2s_ref, b2s_ref, w2t_ref, b2t_ref,
                 onem_ref, y_ref, ldj_ref):
    num_layers = w1_ref.shape[0]
    batch = x_ref.shape[0]

    def layer_body(l, carry):
        x, ldj = carry                 # [B, D], [B, 1]  register-resident state
        w1 = w1_ref[l]                 # [D, H]  input mask pre-folded
        b1 = b1_ref[l]                 # [H]
        w2s = w2s_ref[l]               # [H, D]  s-half of W2
        b2s = b2s_ref[l]               # [D]
        w2t = w2t_ref[l]               # [H, D]  t-half of W2, (1-m) pre-folded
        b2t = b2t_ref[l]               # [D]     (1-m) pre-folded
        one_m = onem_ref[l]            # [D]     (1 - mask), only needed for s

        # Conditioner network: two MXU matmuls + EUP tanh/exp.
        h = jnp.tanh(
            jnp.dot(x, w1, preferred_element_type=jnp.float32) + b1[None, :]
        )
        s = jnp.tanh(
            jnp.dot(h, w2s, preferred_element_type=jnp.float32) + b2s[None, :]
        ) * one_m[None, :]
        t = jnp.dot(h, w2t, preferred_element_type=jnp.float32) + b2t[None, :]

        # Affine coupling.  s, t are zero on masked lanes, so this equals the
        # masked blend x*m + (1-m)*(x*exp(s)+t) exactly.
        x = x * jnp.exp(s) + t
        ldj = ldj + jnp.sum(s, axis=-1, keepdims=True)
        return (x, ldj)

    y0 = x_ref[...]
    ldj0 = jnp.zeros((batch, 1), jnp.float32)
    y, ldj = lax.fori_loop(0, num_layers, layer_body, (y0, ldj0), unroll=True)

    # Single writeback of the final state.
    y_ref[...] = y
    ldj_ref[...] = ldj


@functools.partial(jax.jit, static_argnames=())
def normalizing_flow_forward(x, w1, b1, w2, b2, masks):
    """Runs the full flow. x: [B, D]; stacked per-layer params with leading L."""
    B, D = x.shape
    L, _, H = w1.shape

    one_m = (1.0 - masks).astype(jnp.float32)          # [L, D]
    # Fold the input mask into W1:  (x*m) @ W1 == x @ (m[:,None] * W1).
    w1m = masks[:, :, None] * w1                        # [L, D, H]
    # Split W2/b2 into lane-aligned s/t halves; fold (1-m) into the t half.
    w2s = w2[:, :, :D]                                  # [L, H, D]
    b2s = b2[:, :D]                                     # [L, D]
    w2t = w2[:, :, D:] * one_m[:, None, :]              # [L, H, D]
    b2t = b2[:, D:] * one_m                             # [L, D]

    y, ldj = pl.pallas_call(
        _flow_kernel,
        out_shape=(
            jax.ShapeDtypeStruct((B, D), jnp.float32),
            jax.ShapeDtypeStruct((B, 1), jnp.float32),
        ),
        grid_spec=pltpu.PrefetchScalarGridSpec(
            num_scalar_prefetch=0,
            grid=(1,),
            in_specs=[
                pl.BlockSpec((B, D), lambda i: (0, 0)),          # x
                pl.BlockSpec((L, D, H), lambda i: (0, 0, 0)),    # W1 (masked)
                pl.BlockSpec((L, H), lambda i: (0, 0)),          # b1
                pl.BlockSpec((L, H, D), lambda i: (0, 0, 0)),    # W2_s
                pl.BlockSpec((L, D), lambda i: (0, 0)),          # b2_s
                pl.BlockSpec((L, H, D), lambda i: (0, 0, 0)),    # W2_t (masked)
                pl.BlockSpec((L, D), lambda i: (0, 0)),          # b2_t (masked)
                pl.BlockSpec((L, D), lambda i: (0, 0)),          # 1 - mask
            ],
            out_specs=(
                pl.BlockSpec((B, D), lambda i: (0, 0)),          # y
                pl.BlockSpec((B, 1), lambda i: (0, 0)),          # ldj
            ),
        ),
        compiler_params=pltpu.CompilerParams(
            dimension_semantics=("arbitrary",)
        ),
    )(x, w1m, b1, w2s, b2s, w2t, b2t, one_m)
    return y, ldj[:, 0]
    # TODO(synk): for production B/D/H, add a "parallel" batch grid axis
    # (v7x dual-TC) and bf16 weights with 128/256-aligned D,H; unnecessary at
    # these toy sizes where everything fits one VMEM-resident step.


def _reference_forward(x, w1, b1, w2, b2, masks):
    """Pure-JAX reference (mirrors the PyTorch loop over coupling layers)."""
    D = x.shape[1]
    ldj = jnp.zeros((x.shape[0],), jnp.float32)
    for l in range(w1.shape[0]):
        m = masks[l][None, :]
        one_m = 1.0 - m
        h = jnp.tanh((x * m) @ w1[l] + b1[l][None, :])
        st = h @ w2[l] + b2[l][None, :]
        s = jnp.tanh(st[:, :D]) * one_m
        t = st[:, D:] * one_m
        x = x * m + one_m * (x * jnp.exp(s) + t)
        ldj = ldj + jnp.sum(s, axis=-1)
    return x, ldj


if __name__ == "__main__":
    B, D, H, L = 8, 16, 32, 4  # batch, latent_dim, hidden, num coupling layers

    key = jax.random.PRNGKey(0)
    kx, k1, k2, k3, k4 = jax.random.split(key, 5)

    x = jax.random.normal(kx, (B, D), dtype=jnp.float32)

    # Deterministic parameter init (small scale to keep exp(s) tame).
    w1 = 0.1 * jax.random.normal(k1, (L, D, H), dtype=jnp.float32)
    b1 = 0.1 * jax.random.normal(k2, (L, H), dtype=jnp.float32)
    w2 = 0.1 * jax.random.normal(k3, (L, H, 2 * D), dtype=jnp.float32)
    b2 = 0.1 * jax.random.normal(k4, (L, 2 * D), dtype=jnp.float32)

    # Alternating half masks: even layers keep the first half, odd the second.
    half = D // 2
    base = jnp.concatenate([jnp.ones((half,)), jnp.zeros((D - half,))]).astype(
        jnp.float32
    )
    masks = jnp.stack([base if l % 2 == 0 else 1.0 - base for l in range(L)])

    y, ldj = normalizing_flow_forward(x, w1, b1, w2, b2, masks)
    jax.block_until_ready((y, ldj))

    y_ref, ldj_ref = _reference_forward(x, w1, b1, w2, b2, masks)
    np.testing.assert_allclose(np.asarray(y), np.asarray(y_ref), rtol=1e-5, atol=1e-5)
    np.testing.assert_allclose(
        np.asarray(ldj), np.asarray(ldj_ref), rtol=1e-5, atol=1e-5
    )

    print("KERNEL_OK")
</pallas_src>

<mosaic_0001>
module attributes {stable_mosaic.version = 11 : i64} {
  func.func @_flow_kernel(%arg0: i32, %arg1: memref<8x16xf32, #tpu.memory_space<vmem>>, %arg2: memref<4x16x32xf32, #tpu.memory_space<vmem>>, %arg3: memref<4x32xf32, #tpu.memory_space<vmem>>, %arg4: memref<4x32x16xf32, #tpu.memory_space<vmem>>, %arg5: memref<4x16xf32, #tpu.memory_space<vmem>>, %arg6: memref<4x32x16xf32, #tpu.memory_space<vmem>>, %arg7: memref<4x16xf32, #tpu.memory_space<vmem>>, %arg8: memref<4x16xf32, #tpu.memory_space<vmem>>, %arg9: memref<8x16xf32, #tpu.memory_space<vmem>>, %arg10: memref<8x1xf32, #tpu.memory_space<vmem>>) attributes {dimension_semantics = [#tpu.dimension_semantics<arbitrary>], iteration_bounds = array<i64: 1>, scalar_prefetch = 0 : i64, scratch_operands = 0 : i64, tpu.core_type = #tpu.core_type<tc>, window_params = [{pipeline_mode = #tpu.pipeline_mode<synchronous>, transform_indices = @transform_0, window_bounds = array<i64: 8, 16>}, {pipeline_mode = #tpu.pipeline_mode<synchronous>, transform_indices = @transform_1, window_bounds = array<i64: 4, 16, 32>}, {pipeline_mode = #tpu.pipeline_mode<synchronous>, transform_indices = @transform_2, window_bounds = array<i64: 4, 32>}, {pipeline_mode = #tpu.pipeline_mode<synchronous>, transform_indices = @transform_3, window_bounds = array<i64: 4, 32, 16>}, {pipeline_mode = #tpu.pipeline_mode<synchronous>, transform_indices = @transform_4, window_bounds = array<i64: 4, 16>}, {pipeline_mode = #tpu.pipeline_mode<synchronous>, transform_indices = @transform_5, window_bounds = array<i64: 4, 32, 16>}, {pipeline_mode = #tpu.pipeline_mode<synchronous>, transform_indices = @transform_6, window_bounds = array<i64: 4, 16>}, {pipeline_mode = #tpu.pipeline_mode<synchronous>, transform_indices = @transform_7, window_bounds = array<i64: 4, 16>}, {pipeline_mode = #tpu.pipeline_mode<synchronous>, transform_indices = @transform_8, window_bounds = array<i64: 8, 16>}, {pipeline_mode = #tpu.pipeline_mode<synchronous>, transform_indices = @transform_9, window_bounds = array<i64: 8, 1>}]} {
    %c0 = arith.constant 0 : index
    %c0_0 = arith.constant 0 : index
    %0 = vector.load %arg1[%c0, %c0_0] : memref<8x16xf32, #tpu.memory_space<vmem>>, vector<8x16xf32>
    %cst = arith.constant 0.000000e+00 : f32
    %1 = vector.broadcast %cst : f32 to vector<8x1xf32>
    %c0_i32 = arith.constant 0 : i32
    %2 = arith.index_cast %c0_i32 : i32 to index
    %c0_1 = arith.constant 0 : index
    %c0_2 = arith.constant 0 : index
    %3 = vector.load %arg2[%2, %c0_1, %c0_2] : memref<4x16x32xf32, #tpu.memory_space<vmem>>, vector<1x16x32xf32>
    %4 = vector.shape_cast %3 : vector<1x16x32xf32> to vector<16x32xf32>
    %5 = arith.index_cast %c0_i32 : i32 to index
    %c0_3 = arith.constant 0 : index
    %6 = vector.load %arg3[%5, %c0_3] : memref<4x32xf32, #tpu.memory_space<vmem>>, vector<1x32xf32>
    %7 = vector.shape_cast %6 : vector<1x32xf32> to vector<32xf32>
    %8 = arith.index_cast %c0_i32 : i32 to index
    %c0_4 = arith.constant 0 : index
    %c0_5 = arith.constant 0 : index
    %9 = vector.load %arg4[%8, %c0_4, %c0_5] : memref<4x32x16xf32, #tpu.memory_space<vmem>>, vector<1x32x16xf32>
    %10 = vector.shape_cast %9 : vector<1x32x16xf32> to vector<32x16xf32>
    %11 = arith.index_cast %c0_i32 : i32 to index
    %c0_6 = arith.constant 0 : index
    %12 = vector.load %arg5[%11, %c0_6] : memref<4x16xf32, #tpu.memory_space<vmem>>, vector<1x16xf32>
    %13 = vector.shape_cast %12 : vector<1x16xf32> to vector<16xf32>
    %14 = arith.index_cast %c0_i32 : i32 to index
    %c0_7 = arith.constant 0 : index
    %c0_8 = arith.constant 0 : index
    %15 = vector.load %arg6[%14, %c0_7, %c0_8] : memref<4x32x16xf32, #tpu.memory_space<vmem>>, vector<1x32x16xf32>
    %16 = vector.shape_cast %15 : vector<1x32x16xf32> to vector<32x16xf32>
    %17 = arith.index_cast %c0_i32 : i32 to index
    %c0_9 = arith.constant 0 : index
    %18 = vector.load %arg7[%17, %c0_9] : memref<4x16xf32, #tpu.memory_space<vmem>>, vector<1x16xf32>
    %19 = vector.shape_cast %18 : vector<1x16xf32> to vector<16xf32>
    %20 = arith.index_cast %c0_i32 : i32 to index
    %c0_10 = arith.constant 0 : index
    %21 = vector.load %arg8[%20, %c0_10] : memref<4x16xf32, #tpu.memory_space<vmem>>, vector<1x16xf32>
    %22 = vector.shape_cast %21 : vector<1x16xf32> to vector<16xf32>
    %cst_11 = arith.constant dense<0.000000e+00> : vector<8x32xf32>
    %23 = tpu.matmul %0, %4, %cst_11 {dimension_numbers = #tpu.dot_dimension_numbers<[1], [0], [0], [1], [0, 0, 1, 1], [], []>} : vector<8x16xf32>, vector<16x32xf32>, vector<8x32xf32> -> vector<8x32xf32>
    %24 = vector.shape_cast %7 : vector<32xf32> to vector<1x32xf32>
    %25 = vector.broadcast %24 : vector<1x32xf32> to vector<8x32xf32>
    %26 = arith.addf %23, %25 : vector<8x32xf32>
    %27 = math.tanh %26 : vector<8x32xf32>
    %cst_12 = arith.constant dense<0.000000e+00> : vector<8x16xf32>
    %28 = tpu.matmul %27, %10, %cst_12 {dimension_numbers = #tpu.dot_dimension_numbers<[1], [0], [0], [1], [0, 0, 1, 1], [], []>} : vector<8x32xf32>, vector<32x16xf32>, vector<8x16xf32> -> vector<8x16xf32>
    %29 = vector.shape_cast %13 : vector<16xf32> to vector<1x16xf32>
    %30 = vector.broadcast %29 : vector<1x16xf32> to vector<8x16xf32>
    %31 = arith.addf %28, %30 : vector<8x16xf32>
    %32 = math.tanh %31 : vector<8x16xf32>
    %33 = vector.shape_cast %22 : vector<16xf32> to vector<1x16xf32>
    %34 = vector.broadcast %33 : vector<1x16xf32> to vector<8x16xf32>
    %35 = arith.mulf %32, %34 : vector<8x16xf32>
    %cst_13 = arith.constant dense<0.000000e+00> : vector<8x16xf32>
    %36 = tpu.matmul %27, %16, %cst_13 {dimension_numbers = #tpu.dot_dimension_numbers<[1], [0], [0], [1], [0, 0, 1, 1], [], []>} : vector<8x32xf32>, vector<32x16xf32>, vector<8x16xf32> -> vector<8x16xf32>
    %37 = vector.shape_cast %19 : vector<16xf32> to vector<1x16xf32>
    %38 = vector.broadcast %37 : vector<1x16xf32> to vector<8x16xf32>
    %39 = arith.addf %36, %38 : vector<8x16xf32>
    %40 = math.exp %35 : vector<8x16xf32>
    %41 = arith.mulf %0, %40 : vector<8x16xf32>
    %42 = arith.addf %41, %39 : vector<8x16xf32>
    %cst_14 = arith.constant dense<0.000000e+00> : vector<8xf32>
    %43 = vector.multi_reduction <add>, %35, %cst_14 [1] : vector<8x16xf32> to vector<8xf32>
    %44 = vector.shape_cast %43 : vector<8xf32> to vector<8x1xf32>
    %45 = arith.addf %1, %44 : vector<8x1xf32>
    %c1_i32 = arith.constant 1 : i32
    %46 = arith.index_cast %c1_i32 : i32 to index
    %c0_15 = arith.constant 0 : index
    %c0_16 = arith.constant 0 : index
    %47 = vector.load %arg2[%46, %c0_15, %c0_16] : memref<4x16x32xf32, #tpu.memory_space<vmem>>, vector<1x16x32xf32>
    %48 = vector.shape_cast %47 : vector<1x16x32xf32> to vector<16x32xf32>
    %49 = arith.index_cast %c1_i32 : i32 to index
    %c0_17 = arith.constant 0 : index
    %50 = vector.load %arg3[%49, %c0_17] : memref<4x32xf32, #tpu.memory_space<vmem>>, vector<1x32xf32>
    %51 = vector.shape_cast %50 : vector<1x32xf32> to vector<32xf32>
    %52 = arith.index_cast %c1_i32 : i32 to index
    %c0_18 = arith.constant 0 : index
    %c0_19 = arith.constant 0 : index
    %53 = vector.load %arg4[%52, %c0_18, %c0_19] : memref<4x32x16xf32, #tpu.memory_space<vmem>>, vector<1x32x16xf32>
    %54 = vector.shape_cast %53 : vector<1x32x16xf32> to vector<32x16xf32>
    %55 = arith.index_cast %c1_i32 : i32 to index
    %c0_20 = arith.constant 0 : index
    %56 = vector.load %arg5[%55, %c0_20] : memref<4x16xf32, #tpu.memory_space<vmem>>, vector<1x16xf32>
    %57 = vector.shape_cast %56 : vector<1x16xf32> to vector<16xf32>
    %58 = arith.index_cast %c1_i32 : i32 to index
    %c0_21 = arith.constant 0 : index
    %c0_22 = arith.constant 0 : index
    %59 = vector.load %arg6[%58, %c0_21, %c0_22] : memref<4x32x16xf32, #tpu.memory_space<vmem>>, vector<1x32x16xf32>
    %60 = vector.shape_cast %59 : vector<1x32x16xf32> to vector<32x16xf32>
    %61 = arith.index_cast %c1_i32 : i32 to index
    %c0_23 = arith.constant 0 : index
    %62 = vector.load %arg7[%61, %c0_23] : memref<4x16xf32, #tpu.memory_space<vmem>>, vector<1x16xf32>
    %63 = vector.shape_cast %62 : vector<1x16xf32> to vector<16xf32>
    %64 = arith.index_cast %c1_i32 : i32 to index
    %c0_24 = arith.constant 0 : index
    %65 = vector.load %arg8[%64, %c0_24] : memref<4x16xf32, #tpu.memory_space<vmem>>, vector<1x16xf32>
    %66 = vector.shape_cast %65 : vector<1x16xf32> to vector<16xf32>
    %cst_25 = arith.constant dense<0.000000e+00> : vector<8x32xf32>
    %67 = tpu.matmul %42, %48, %cst_25 {dimension_numbers = #tpu.dot_dimension_numbers<[1], [0], [0], [1], [0, 0, 1, 1], [], []>} : vector<8x16xf32>, vector<16x32xf32>, vector<8x32xf32> -> vector<8x32xf32>
    %68 = vector.shape_cast %51 : vector<32xf32> to vector<1x32xf32>
    %69 = vector.broadcast %68 : vector<1x32xf32> to vector<8x32xf32>
    %70 = arith.addf %67, %69 : vector<8x32xf32>
    %71 = math.tanh %70 : vector<8x32xf32>
    %cst_26 = arith.constant dense<0.000000e+00> : vector<8x16xf32>
    %72 = tpu.matmul %71, %54, %cst_26 {dimension_numbers = #tpu.dot_dimension_numbers<[1], [0], [0], [1], [0, 0, 1, 1], [], []>} : vector<8x32xf32>, vector<32x16xf32>, vector<8x16xf32> -> vector<8x16xf32>
    %73 = vector.shape_cast %57 : vector<16xf32> to vector<1x16xf32>
    %74 = vector.broadcast %73 : vector<1x16xf32> to vector<8x16xf32>
    %75 = arith.addf %72, %74 : vector<8x16xf32>
    %76 = math.tanh %75 : vector<8x16xf32>
    %77 = vector.shape_cast %66 : vector<16xf32> to vector<1x16xf32>
    %78 = vector.broadcast %77 : vector<1x16xf32> to vector<8x16xf32>
    %79 = arith.mulf %76, %78 : vector<8x16xf32>
    %cst_27 = arith.constant dense<0.000000e+00> : vector<8x16xf32>
    %80 = tpu.matmul %71, %60, %cst_27 {dimension_numbers = #tpu.dot_dimension_numbers<[1], [0], [0], [1], [0, 0, 1, 1], [], []>} : vector<8x32xf32>, vector<32x16xf32>, vector<8x16xf32> -> vector<8x16xf32>
    %81 = vector.shape_cast %63 : vector<16xf32> to vector<1x16xf32>
    %82 = vector.broadcast %81 : vector<1x16xf32> to vector<8x16xf32>
    %83 = arith.addf %80, %82 : vector<8x16xf32>
    %84 = math.exp %79 : vector<8x16xf32>
    %85 = arith.mulf %42, %84 : vector<8x16xf32>
    %86 = arith.addf %85, %83 : vector<8x16xf32>
    %cst_28 = arith.constant dense<0.000000e+00> : vector<8xf32>
    %87 = vector.multi_reduction <add>, %79, %cst_28 [1] : vector<8x16xf32> to vector<8xf32>
    %88 = vector.shape_cast %87 : vector<8xf32> to vector<8x1xf32>
    %89 = arith.addf %45, %88 : vector<8x1xf32>
    %c2_i32 = arith.constant 2 : i32
    %90 = arith.index_cast %c2_i32 : i32 to index
    %c0_29 = arith.constant 0 : index
    %c0_30 = arith.constant 0 : index
    %91 = vector.load %arg2[%90, %c0_29, %c0_30] : memref<4x16x32xf32, #tpu.memory_space<vmem>>, vector<1x16x32xf32>
    %92 = vector.shape_cast %91 : vector<1x16x32xf32> to vector<16x32xf32>
    %93 = arith.index_cast %c2_i32 : i32 to index
    %c0_31 = arith.constant 0 : index
    %94 = vector.load %arg3[%93, %c0_31] : memref<4x32xf32, #tpu.memory_space<vmem>>, vector<1x32xf32>
    %95 = vector.shape_cast %94 : vector<1x32xf32> to vector<32xf32>
    %96 = arith.index_cast %c2_i32 : i32 to index
    %c0_32 = arith.constant 0 : index
    %c0_33 = arith.constant 0 : index
    %97 = vector.load %arg4[%96, %c0_32, %c0_33] : memref<4x32x16xf32, #tpu.memory_space<vmem>>, vector<1x32x16xf32>
    %98 = vector.shape_cast %97 : vector<1x32x16xf32> to vector<32x16xf32>
    %99 = arith.index_cast %c2_i32 : i32 to index
    %c0_34 = arith.constant 0 : index
    %100 = vector.load %arg5[%99, %c0_34] : memref<4x16xf32, #tpu.memory_space<vmem>>, vector<1x16xf32>
    %101 = vector.shape_cast %100 : vector<1x16xf32> to vector<16xf32>
    %102 = arith.index_cast %c2_i32 : i32 to index
    %c0_35 = arith.constant 0 : index
    %c0_36 = arith.constant 0 : index
    %103 = vector.load %arg6[%102, %c0_35, %c0_36] : memref<4x32x16xf32, #tpu.memory_space<vmem>>, vector<1x32x16xf32>
    %104 = vector.shape_cast %103 : vector<1x32x16xf32> to vector<32x16xf32>
    %105 = arith.index_cast %c2_i32 : i32 to index
    %c0_37 = arith.constant 0 : index
    %106 = vector.load %arg7[%105, %c0_37] : memref<4x16xf32, #tpu.memory_space<vmem>>, vector<1x16xf32>
    %107 = vector.shape_cast %106 : vector<1x16xf32> to vector<16xf32>
    %108 = arith.index_cast %c2_i32 : i32 to index
    %c0_38 = arith.constant 0 : index
    %109 = vector.load %arg8[%108, %c0_38] : memref<4x16xf32, #tpu.memory_space<vmem>>, vector<1x16xf32>
    %110 = vector.shape_cast %109 : vector<1x16xf32> to vector<16xf32>
    %cst_39 = arith.constant dense<0.000000e+00> : vector<8x32xf32>
    %111 = tpu.matmul %86, %92, %cst_39 {dimension_numbers = #tpu.dot_dimension_numbers<[1], [0], [0], [1], [0, 0, 1, 1], [], []>} : vector<8x16xf32>, vector<16x32xf32>, vector<8x32xf32> -> vector<8x32xf32>
    %112 = vector.shape_cast %95 : vector<32xf32> to vector<1x32xf32>
    %113 = vector.broadcast %112 : vector<1x32xf32> to vector<8x32xf32>
    %114 = arith.addf %111, %113 : vector<8x32xf32>
    %115 = math.tanh %114 : vector<8x32xf32>
    %cst_40 = arith.constant dense<0.000000e+00> : vector<8x16xf32>
    %116 = tpu.matmul %115, %98, %cst_40 {dimension_numbers = #tpu.dot_dimension_numbers<[1], [0], [0], [1], [0, 0, 1, 1], [], []>} : vector<8x32xf32>, vector<32x16xf32>, vector<8x16xf32> -> vector<8x16xf32>
    %117 = vector.shape_cast %101 : vector<16xf32> to vector<1x16xf32>
    %118 = vector.broadcast %117 : vector<1x16xf32> to vector<8x16xf32>
    %119 = arith.addf %116, %118 : vector<8x16xf32>
    %120 = math.tanh %119 : vector<8x16xf32>
    %121 = vector.shape_cast %110 : vector<16xf32> to vector<1x16xf32>
    %122 = vector.broadcast %121 : vector<1x16xf32> to vector<8x16xf32>
    %123 = arith.mulf %120, %122 : vector<8x16xf32>
    %cst_41 = arith.constant dense<0.000000e+00> : vector<8x16xf32>
    %124 = tpu.matmul %115, %104, %cst_41 {dimension_numbers = #tpu.dot_dimension_numbers<[1], [0], [0], [1], [0, 0, 1, 1], [], []>} : vector<8x32xf32>, vector<32x16xf32>, vector<8x16xf32> -> vector<8x16xf32>
    %125 = vector.shape_cast %107 : vector<16xf32> to vector<1x16xf32>
    %126 = vector.broadcast %125 : vector<1x16xf32> to vector<8x16xf32>
    %127 = arith.addf %124, %126 : vector<8x16xf32>
    %128 = math.exp %123 : vector<8x16xf32>
    %129 = arith.mulf %86, %128 : vector<8x16xf32>
    %130 = arith.addf %129, %127 : vector<8x16xf32>
    %cst_42 = arith.constant dense<0.000000e+00> : vector<8xf32>
    %131 = vector.multi_reduction <add>, %123, %cst_42 [1] : vector<8x16xf32> to vector<8xf32>
    %132 = vector.shape_cast %131 : vector<8xf32> to vector<8x1xf32>
    %133 = arith.addf %89, %132 : vector<8x1xf32>
    %c3_i32 = arith.constant 3 : i32
    %134 = arith.index_cast %c3_i32 : i32 to index
    %c0_43 = arith.constant 0 : index
    %c0_44 = arith.constant 0 : index
    %135 = vector.load %arg2[%134, %c0_43, %c0_44] : memref<4x16x32xf32, #tpu.memory_space<vmem>>, vector<1x16x32xf32>
    %136 = vector.shape_cast %135 : vector<1x16x32xf32> to vector<16x32xf32>
    %137 = arith.index_cast %c3_i32 : i32 to index
    %c0_45 = arith.constant 0 : index
    %138 = vector.load %arg3[%137, %c0_45] : memref<4x32xf32, #tpu.memory_space<vmem>>, vector<1x32xf32>
    %139 = vector.shape_cast %138 : vector<1x32xf32> to vector<32xf32>
    %140 = arith.index_cast %c3_i32 : i32 to index
    %c0_46 = arith.constant 0 : index
    %c0_47 = arith.constant 0 : index
    %141 = vector.load %arg4[%140, %c0_46, %c0_47] : memref<4x32x16xf32, #tpu.memory_space<vmem>>, vector<1x32x16xf32>
    %142 = vector.shape_cast %141 : vector<1x32x16xf32> to vector<32x16xf32>
    %143 = arith.index_cast %c3_i32 : i32 to index
    %c0_48 = arith.constant 0 : index
    %144 = vector.load %arg5[%143, %c0_48] : memref<4x16xf32, #tpu.memory_space<vmem>>, vector<1x16xf32>
    %145 = vector.shape_cast %144 : vector<1x16xf32> to vector<16xf32>
    %146 = arith.index_cast %c3_i32 : i32 to index
    %c0_49 = arith.constant 0 : index
    %c0_50 = arith.constant 0 : index
    %147 = vector.load %arg6[%146, %c0_49, %c0_50] : memref<4x32x16xf32, #tpu.memory_space<vmem>>, vector<1x32x16xf32>
    %148 = vector.shape_cast %147 : vector<1x32x16xf32> to vector<32x16xf32>
    %149 = arith.index_cast %c3_i32 : i32 to index
    %c0_51 = arith.constant 0 : index
    %150 = vector.load %arg7[%149, %c0_51] : memref<4x16xf32, #tpu.memory_space<vmem>>, vector<1x16xf32>
    %151 = vector.shape_cast %150 : vector<1x16xf32> to vector<16xf32>
    %152 = arith.index_cast %c3_i32 : i32 to index
    %c0_52 = arith.constant 0 : index
    %153 = vector.load %arg8[%152, %c0_52] : memref<4x16xf32, #tpu.memory_space<vmem>>, vector<1x16xf32>
    %154 = vector.shape_cast %153 : vector<1x16xf32> to vector<16xf32>
    %cst_53 = arith.constant dense<0.000000e+00> : vector<8x32xf32>
    %155 = tpu.matmul %130, %136, %cst_53 {dimension_numbers = #tpu.dot_dimension_numbers<[1], [0], [0], [1], [0, 0, 1, 1], [], []>} : vector<8x16xf32>, vector<16x32xf32>, vector<8x32xf32> -> vector<8x32xf32>
    %156 = vector.shape_cast %139 : vector<32xf32> to vector<1x32xf32>
    %157 = vector.broadcast %156 : vector<1x32xf32> to vector<8x32xf32>
    %158 = arith.addf %155, %157 : vector<8x32xf32>
    %159 = math.tanh %158 : vector<8x32xf32>
    %cst_54 = arith.constant dense<0.000000e+00> : vector<8x16xf32>
    %160 = tpu.matmul %159, %142, %cst_54 {dimension_numbers = #tpu.dot_dimension_numbers<[1], [0], [0], [1], [0, 0, 1, 1], [], []>} : vector<8x32xf32>, vector<32x16xf32>, vector<8x16xf32> -> vector<8x16xf32>
    %161 = vector.shape_cast %145 : vector<16xf32> to vector<1x16xf32>
    %162 = vector.broadcast %161 : vector<1x16xf32> to vector<8x16xf32>
    %163 = arith.addf %160, %162 : vector<8x16xf32>
    %164 = math.tanh %163 : vector<8x16xf32>
    %165 = vector.shape_cast %154 : vector<16xf32> to vector<1x16xf32>
    %166 = vector.broadcast %165 : vector<1x16xf32> to vector<8x16xf32>
    %167 = arith.mulf %164, %166 : vector<8x16xf32>
    %cst_55 = arith.constant dense<0.000000e+00> : vector<8x16xf32>
    %168 = tpu.matmul %159, %148, %cst_55 {dimension_numbers = #tpu.dot_dimension_numbers<[1], [0], [0], [1], [0, 0, 1, 1], [], []>} : vector<8x32xf32>, vector<32x16xf32>, vector<8x16xf32> -> vector<8x16xf32>
    %169 = vector.shape_cast %151 : vector<16xf32> to vector<1x16xf32>
    %170 = vector.broadcast %169 : vector<1x16xf32> to vector<8x16xf32>
    %171 = arith.addf %168, %170 : vector<8x16xf32>
    %172 = math.exp %167 : vector<8x16xf32>
    %173 = arith.mulf %130, %172 : vector<8x16xf32>
    %174 = arith.addf %173, %171 : vector<8x16xf32>
    %cst_56 = arith.constant dense<0.000000e+00> : vector<8xf32>
    %175 = vector.multi_reduction <add>, %167, %cst_56 [1] : vector<8x16xf32> to vector<8xf32>
    %176 = vector.shape_cast %175 : vector<8xf32> to vector<8x1xf32>
    %177 = arith.addf %133, %176 : vector<8x1xf32>
    %c4_i32 = arith.constant 4 : i32
    %c0_57 = arith.constant 0 : index
    %c0_58 = arith.constant 0 : index
    %178 = vector.load %arg9[%c0_57, %c0_58] : memref<8x16xf32, #tpu.memory_space<vmem>>, vector<8x16xf32>
    tpu.vector_store %arg9[%c0_57, %c0_58], %174 {strides = array<i32>} : memref<8x16xf32, #tpu.memory_space<vmem>>, vector<8x16xf32>,
    %c0_59 = arith.constant 0 : index
    %c0_60 = arith.constant 0 : index
    %179 = vector.load %arg10[%c0_59, %c0_60] : memref<8x1xf32, #tpu.memory_space<vmem>>, vector<8x1xf32>
    tpu.vector_store %arg10[%c0_59, %c0_60], %177 {strides = array<i32>} : memref<8x1xf32, #tpu.memory_space<vmem>>, vector<8x1xf32>,
    return
  }
  func.func @transform_0(%arg0: i32) -> (i32, i32) {
    %c0_i32 = arith.constant 0 : i32
    %c0_i32_0 = arith.constant 0 : i32
    %c0_i32_1 = arith.constant 0 : i32
    return %c0_i32, %c0_i32_0 : i32, i32
  }
  func.func @transform_1(%arg0: i32) -> (i32, i32, i32) {
    %c0_i32 = arith.constant 0 : i32
    %c0_i32_0 = arith.constant 0 : i32
    %c0_i32_1 = arith.constant 0 : i32
    %c0_i32_2 = arith.constant 0 : i32
    return %c0_i32, %c0_i32_0, %c0_i32_1 : i32, i32, i32
  }
  func.func @transform_2(%arg0: i32) -> (i32, i32) {
    %c0_i32 = arith.constant 0 : i32
    %c0_i32_0 = arith.constant 0 : i32
    %c0_i32_1 = arith.constant 0 : i32
    return %c0_i32, %c0_i32_0 : i32, i32
  }
  func.func @transform_3(%arg0: i32) -> (i32, i32, i32) {
    %c0_i32 = arith.constant 0 : i32
    %c0_i32_0 = arith.constant 0 : i32
    %c0_i32_1 = arith.constant 0 : i32
    %c0_i32_2 = arith.constant 0 : i32
    return %c0_i32, %c0_i32_0, %c0_i32_1 : i32, i32, i32
  }
  func.func @transform_4(%arg0: i32) -> (i32, i32) {
    %c0_i32 = arith.constant 0 : i32
    %c0_i32_0 = arith.constant 0 : i32
    %c0_i32_1 = arith.constant 0 : i32
    return %c0_i32, %c0_i32_0 : i32, i32
  }
  func.func @transform_5(%arg0: i32) -> (i32, i32, i32) {
    %c0_i32 = arith.constant 0 : i32
    %c0_i32_0 = arith.constant 0 : i32
    %c0_i32_1 = arith.constant 0 : i32
    %c0_i32_2 = arith.constant 0 : i32
    return %c0_i32, %c0_i32_0, %c0_i32_1 : i32, i32, i32
  }
  func.func @transform_6(%arg0: i32) -> (i32, i32) {
    %c0_i32 = arith.constant 0 : i32
    %c0_i32_0 = arith.constant 0 : i32
    %c0_i32_1 = arith.constant 0 : i32
    return %c0_i32, %c0_i32_0 : i32, i32
  }
  func.func @transform_7(%arg0: i32) -> (i32, i32) {
    %c0_i32 = arith.constant 0 : i32
    %c0_i32_0 = arith.constant 0 : i32
    %c0_i32_1 = arith.constant 0 : i32
    return %c0_i32, %c0_i32_0 : i32, i32
  }
  func.func @transform_8(%arg0: i32) -> (i32, i32) {
    %c0_i32 = arith.constant 0 : i32
    %c0_i32_0 = arith.constant 0 : i32
    %c0_i32_1 = arith.constant 0 : i32
    return %c0_i32, %c0_i32_0 : i32, i32
  }
  func.func @transform_9(%arg0: i32) -> (i32, i32) {
    %c0_i32 = arith.constant 0 : i32
    %c0_i32_0 = arith.constant 0 : i32
    %c0_i32_1 = arith.constant 0 : i32
    return %c0_i32, %c0_i32_0 : i32, i32
  }
}

</mosaic_0001>

<bundles_post_ra>
// kernel: normalizing_flow_forward.1
= control target key start
LH: loop header
LB: loop body
LE: loop exit
PB: predicated region body
PF: predicated region fallthrough
CT: control target
= control target key end

     0   :  { %v1431_v2 = vmov 0.0|0.0   ;;  %vm1432_vm0 = vmmov 0   ;;  %v1433_v4 = vmov 0.0   ;;  %s1732_s0 = inlined_call_operand.vmem [shape: f32[8,16], index: 0, kind: input, shape index: {}]   ;;  %s1733_s1 = inlined_call_operand.vmem [shape: f32[4,16,32], index: 1, kind: input, shape index: {}]   ;;  %s1734_s2 = inlined_call_operand.vmem [shape: f32[4,32], index: 2, kind: input, shape index: {}]   ;;  %s1735_s3 = inlined_call_operand.vmem [shape: f32[4,32,16], index: 3, kind: input, shape index: {}]   ;;  %s1736_s4 = inlined_call_operand.vmem [shape: f32[4,16], index: 4, kind: input, shape index: {}]   ;;  %s1737_s5 = inlined_call_operand.vmem [shape: f32[4,32,16], index: 5, kind: input, shape index: {}]   ;;  %s1738_s6 = inlined_call_operand.vmem [shape: f32[4,16], index: 6, kind: input, shape index: {}]   ;;  %s1739_s7 = inlined_call_operand.vmem [shape: f32[4,16], index: 7, kind: input, shape index: {}]   ;;  %s1740_s8 = inlined_call_operand.hbm [shape: f32[8,16], index: 8, kind: output, shape index: {0}]   ;;  %s1741_s9 = inlined_call_operand.vmem [shape: f32[8,1], index: 9, kind: output, shape index: {1}]  }
   0x1   :  { %v33_v0 = vld [vmem:[%s1733_s1] sm:$0xff]  ;;  %v34_v1 = vld [vmem:[%s1733_s1 + $0x8] sm:$0xff]  ;;  %1319 = vmatprep.subr.bf16.mxu0 %v1431_v2  ;;  %1207 = vmatprep.mubr.msk.f32.mxu0 %vm1432_vm0, %v1433_v4 }
   0x2   :  { %v1320_v3 = vpack.c.bf16 %v34_v1, %v33_v0 }
   0x3   :  { %15 = vsyncpa [#allocation3], 0  ;;  %1322 = vmatprep.subr.bf16.mxu1 %v1431_v2  ;;  %1218 = vmatprep.mubr.msk.f32.mxu1 %vm1432_vm0, %v1433_v4  ;;  %v32_v5 = vld [vmem:[%s1732_s0] sm:$0xff]  ;;  %vm51_vm1 = vcmask 130048   ;;  %v37_v7 = vld [vmem:[%s1735_s3 + $0x8] sm:$0xff]  ;;  %vm130_vm2 = vcmask 261120  }
   0x4   :  { %1321 = vmatpush3.bf16.msra.mxu0 %v1320_v3  ;;  %v36_v6 = vld [vmem:[%s1735_s3] sm:$0xff]  ;;  %v42_v10 = vld [vmem:[%s1737_s5 + $0x8] sm:$0xff]  ;;  %v38_v11 = vld [vmem:[%s1735_s3 + $0x10] sm:$0xff] }
   0x5   :  { %1328 = vmatprep.subr.bf16.mxu0 %v1431_v2  ;;  %v41_v8 = vld [vmem:[%s1737_s5] sm:$0xff]  ;;  %v1323_v9 = vpack.c.bf16 %v37_v7, %v36_v6  ;;  %v39_v12 = vld [vmem:[%s1735_s3 + $0x18] sm:$0xff]  ;;  %v43_v14 = vld [vmem:[%s1737_s5 + $0x10] sm:$0xff] }
   0x6   :  { %v1329_v13 = vpack.c.bf16 %v42_v10, %v41_v8  ;;  %v44_v15 = vld [vmem:[%s1737_s5 + $0x18] sm:$0xff]  ;;  %v1326_v16 = vpack.c.bf16 %v39_v12, %v38_v11  ;;  %v1093_v18 = vld [vmem:[%s1734_s2] ss:$0 sm:$0xff]  ;;  %v1100_v23 = vld [vmem:[%s1733_s1 + $0x10] sm:$0xff] }
   0x7   :  { %1208 = vmatmul.mubr.msk.f32.vlgmr.msra.gmra.mrb[0].mxu0 %vm51_vm1, %v32_v5  ;;  %1324 = vmatpush3.bf16.msra.mxu1 %v1323_v9  ;;  %v1332_v17 = vpack.c.bf16 %v44_v15, %v43_v14  ;;  %v1101_v24 = vld [vmem:[%s1733_s1 + $0x18] sm:$0xff]  ;;  %v1095_v26 = vld [vmem:[%s1736_s4] ss:$0 sm:$0xff]  ;;  %v1103_v43 = vld [vmem:[%s1735_s3 + $0x28] sm:$0xff] }
   0x8   :  { %1229 = vmatprep.mubr.msk.f32.mxu0 %vm1432_vm0, %v1433_v4  ;;  %1330 = vmatpush3.bf16.msra.mxu0 %v1329_v13  ;;  %v1335_v25 = vpack.c.bf16 %v1101_v24, %v1100_v23  ;;  %v1097_v32 = vld [vmem:[%s1739_s7] ss:$0 sm:$0xff]  ;;  %v1107_v46 = vld [vmem:[%s1737_s5 + $0x28] sm:$0xff]  ;;  %v1104_v47 = vld [vmem:[%s1735_s3 + $0x30] sm:$0xff] }
   0x9   :  { %1325 = vmatprep.subr.bf16.mxu1 %v1431_v2  ;;  %1331 = vmatprep.subr.bf16.mxu0 %v1431_v2  ;;  %v1098_v37 = vld [vmem:[%s1738_s6] ss:$0 sm:$0xff]  ;;  %v1105_v48 = vld [vmem:[%s1735_s3 + $0x38] sm:$0xff]  ;;  %v1108_v50 = vld [vmem:[%s1737_s5 + $0x30] sm:$0xff] }
   0xa   :  { %v1102_v42 = vld [vmem:[%s1735_s3 + $0x20] sm:$0xff]  ;;  %v1109_v51 = vld [vmem:[%s1737_s5 + $0x38] sm:$0xff]  ;;  %v1341_v52 = vpack.c.bf16 %v1105_v48, %v1104_v47  ;;  %v1118_v60 = vld [vmem:[%s1733_s1 + $0x28] sm:$0xff] }
   0xb   :  { %1327 = vmatpush3.bf16.msra.mxu1 %v1326_v16  ;;  %v1106_v44 = vld [vmem:[%s1737_s5 + $0x20] sm:$0xff]  ;;  %v1338_v45 = vpack.c.bf16 %v1103_v43, %v1102_v42  ;;  %v1347_v53 = vpack.c.bf16 %v1109_v51, %v1108_v50  ;;  %v1125_v24 = vld [vmem:[%s1737_s5 + $0x50] sm:$0xff] }
   0xc   :  { %1333 = vmatpush3.bf16.msra.mxu0 %v1332_v17  ;;  %1334 = vmatprep.subr.bf16.mxu1 %v1431_v2  ;;  %v1344_v49 = vpack.c.bf16 %v1107_v46, %v1106_v44  ;;  %v1110_v54 = vld [vmem:[%s1734_s2 + $0x1] ss:$0 sm:$0xff]  ;;  %v1120_v17 = vld [vmem:[%s1735_s3 + $0x48] sm:$0xff]  ;;  %v1131_v42 = vld [vmem:[%s1739_s7 + $0x2] ss:$0 sm:$0xff] }
   0xd   :  { %1337 = vmatprep.subr.bf16.mxu0 %v1431_v2  ;;  %v1117_v59 = vld [vmem:[%s1733_s1 + $0x20] sm:$0xff] }
   0xe   :  { %v1350_v61 = vpack.c.bf16 %v1118_v60, %v1117_v59  ;;  %v1112_v62 = vld [vmem:[%s1736_s4 + $0x1] ss:$0 sm:$0xff]  ;;  %v1132_v47 = vld [vmem:[%s1738_s6 + $0x2] ss:$0 sm:$0xff]  ;;  %v1142_v59 = vld [vmem:[%s1737_s5 + $0x70] sm:$0xff] }
   0xf   :  { %v1114_v6 = vld [vmem:[%s1739_s7 + $0x1] ss:$0 sm:$0xff]  ;;  %v1143_v60 = vld [vmem:[%s1737_s5 + $0x78] sm:$0xff] }
  0x10   :  { %v1115_v11 = vld [vmem:[%s1738_s6 + $0x1] ss:$0 sm:$0xff] }
  0x11   :  { %v1119_v16 = vld [vmem:[%s1735_s3 + $0x40] sm:$0xff] }
  0xda   :  { %v121_v19 = vpop.f32.mrb[0].mxu0 }
  0xdb   :  { %v122_v20 = vadd.f32 %v1093_v18, %v121_v19  ;;  %v1209_v21 = vpop.f32.mrb[1].mxu0  ;;  %v1123_v18 = vld [vmem:[%s1737_s5 + $0x40] sm:$0xff]  ;;  %v1353_v19 = vpack.c.bf16 %v1120_v17, %v1119_v16 }
  0xdc   :  { %v1121_v21 = vld [vmem:[%s1735_s3 + $0x50] sm:$0xff]  ;;  %v1149_v16 = vld [vmem:[%s1738_s6 + $0x3] ss:$0 sm:$0xff] }
  0xdd   :  { %1383 = vtanh.f32 %v122_v20  ;;  %v1124_v20 = vld [vmem:[%s1737_s5 + $0x48] sm:$0xff] }
  0xde   :  { %v1359_v23 = vpack.c.bf16 %v1124_v20, %v1123_v18 }
  0xe7   :  { %v1384_v22 = vpop.eup %1383 }
  0xe8   :  { %1219 = vmatmul.mubr.msk.f32.vlgmr.msra.gmra.mrb[0].mxu1 %vm130_vm2, %v1384_v22  ;;  %1230 = vmatmul.mubr.msk.f32.vlgmr.msra.gmra.mrb[2].mxu0 %vm130_vm2, %v1384_v22  ;;  %v1122_v22 = vld [vmem:[%s1735_s3 + $0x58] sm:$0xff] }
  0xe9   :  { %1236 = vmatprep.mubr.msk.f32.mxu1 %vm1432_vm0, %v1433_v4  ;;  %1247 = vmatprep.mubr.msk.f32.mxu0 %vm1432_vm0, %v1433_v4 }
  0xea   :  { %1336 = vmatpush3.bf16.msra.mxu1 %v1335_v25  ;;  %1339 = vmatpush3.bf16.msra.mxu0 %v1338_v45  ;;  %v1126_v25 = vld [vmem:[%s1737_s5 + $0x58] sm:$0xff] }
  0xeb   :  { %1343 = vmatprep.subr.bf16.mxu1 %v1431_v2  ;;  %1340 = vmatprep.subr.bf16.mxu0 %v1431_v2 }
  0xee   :  { %1342 = vmatpush3.bf16.msra.mxu0 %v1341_v52  ;;  %v1136_v52 = vld [vmem:[%s1735_s3 + $0x60] sm:$0xff] }
  0xef   :  { %1349 = vmatprep.subr.bf16.mxu0 %v1431_v2 }
 0x1bb   :  { %v200_v27 = vpop.f32.mrb[0].mxu1  ;;  %v280_v28 = vpop.f32.mrb[2].mxu0 }
 0x1bc   :  { %v201_v29 = vadd.f32 %v1095_v26, %v200_v27  ;;  %v1220_v30 = vpop.f32.mrb[1].mxu1  ;;  %v1231_v31 = vpop.f32.mrb[3].mxu0  ;;  %v281_v39 = vadd.f32 %v1098_v37, %v280_v28  ;;  %v1356_v26 = vpack.c.bf16 %v1122_v22, %v1121_v21  ;;  %v1362_v27 = vpack.c.bf16 %v1126_v25, %v1125_v24  ;;  %v1127_v28 = vld [vmem:[%s1734_s2 + $0x2] ss:$0 sm:$0xff] }
 0x1be   :  { %1385 = vtanh.f32 %v201_v29 }
 0x1c8   :  { %v1386_v33 = vpop.eup %1385 }
 0x1c9   :  { %v209_v34 = vmul.f32 %v1386_v33, %v1097_v32  ;;  %v1134_v33 = vld [vmem:[%s1733_s1 + $0x30] sm:$0xff] }
 0x1cb   :  { %v288_v35 = vsel %vm51_vm1, %v209_v34, 0.0  ;;  %v284_v36 = vmul.f32 1.442695, %v209_v34  ;;  %v1135_v34 = vld [vmem:[%s1733_s1 + $0x38] sm:$0xff] }
 0x1cc   :  { %289 = vadd.xlane.f32.xlu0 %v288_v35  ;;  %v1365_v35 = vpack.c.bf16 %v1135_v34, %v1134_v33 }
 0x1cd   :  { %1387 = vpow2.f32 %v284_v36  ;;  %v1129_v36 = vld [vmem:[%s1736_s4 + $0x2] ss:$0 sm:$0xff] }
 0x1d7   :  { %v1388_v38 = vpop.eup %1387 }
 0x1d8   :  { %v286_v40 = vmul.f32 %v1388_v38, %v32_v5 }
 0x1da   :  { %v287_v41 = vadd.f32 %v286_v40, %v281_v39 }
 0x1dc   :  { %1237 = vmatmul.mubr.msk.f32.vlgmr.msra.gmra.mrb[2].mxu1 %vm51_vm1, %v287_v41 }
 0x1dd   :  { %1258 = vmatprep.mubr.msk.f32.mxu1 %vm1432_vm0, %v1433_v4  ;;  %1345 = vmatpush3.bf16.msra.mxu1 %v1344_v49 }
 0x1de   :  { %1346 = vmatprep.subr.bf16.mxu1 %v1431_v2 }
 0x1e1   :  { %1348 = vmatpush3.bf16.msra.mxu1 %v1347_v53  ;;  %v1137_v53 = vld [vmem:[%s1735_s3 + $0x68] sm:$0xff] }
 0x1e2   :  { %1352 = vmatprep.subr.bf16.mxu1 %v1431_v2 }
 0x2af   :  { %v382_v55 = vpop.f32.mrb[2].mxu1 }
 0x2b0   :  { %v383_v56 = vadd.f32 %v1110_v54, %v382_v55  ;;  %v1238_v57 = vpop.f32.mrb[3].mxu1  ;;  %v1140_v54 = vld [vmem:[%s1737_s5 + $0x60] sm:$0xff]  ;;  %v1368_v55 = vpack.c.bf16 %v1137_v53, %v1136_v52 }
 0x2b1   :  { %v1139_v57 = vld [vmem:[%s1735_s3 + $0x78] sm:$0xff] }
 0x2b2   :  { %1389 = vtanh.f32 %v383_v56  ;;  %v1141_v56 = vld [vmem:[%s1737_s5 + $0x68] sm:$0xff] }
 0x2bc   :  { %v1390_v58 = vpop.eup %1389 }
 0x2bd   :  { %1248 = vmatmul.mubr.msk.f32.vlgmr.msra.gmra.mrb[4].mxu0 %vm130_vm2, %v1390_v58  ;;  %1259 = vmatmul.mubr.msk.f32.vlgmr.msra.gmra.mrb[4].mxu1 %vm130_vm2, %v1390_v58  ;;  %v1374_v58 = vpack.c.bf16 %v1141_v56, %v1140_v54 }
 0x2be   :  { %1265 = vmatprep.mubr.msk.f32.mxu0 %vm1432_vm0, %v1433_v4  ;;  %1276 = vmatprep.mubr.msk.f32.mxu1 %vm1432_vm0, %v1433_v4 }
 0x2bf   :  { %1351 = vmatpush3.bf16.msra.mxu0 %v1350_v61  ;;  %1354 = vmatpush3.bf16.msra.mxu1 %v1353_v19 }
 0x2c0   :  { %1358 = vmatprep.subr.bf16.mxu0 %v1431_v2  ;;  %1355 = vmatprep.subr.bf16.mxu1 %v1431_v2 }
 0x2c3   :  { %1357 = vmatpush3.bf16.msra.mxu1 %v1356_v26 }
 0x2c4   :  { %1364 = vmatprep.subr.bf16.mxu1 %v1431_v2 }
 0x390   :  { %v460_v63 = vpop.f32.mrb[4].mxu0  ;;  %v540_v0 = vpop.f32.mrb[4].mxu1 }
 0x391   :  { %v461_v1 = vadd.f32 %v1112_v62, %v460_v63  ;;  %v1249_v3 = vpop.f32.mrb[5].mxu0  ;;  %v1260_v5 = vpop.f32.mrb[5].mxu1  ;;  %v541_v13 = vadd.f32 %v1115_v11, %v540_v0  ;;  %v1377_v62 = vpack.c.bf16 %v1143_v60, %v1142_v59  ;;  %v1144_v63 = vld [vmem:[%s1734_s2 + $0x3] ss:$0 sm:$0xff] }
 0x392   :  { %v1148_v11 = vld [vmem:[%s1739_s7 + $0x3] ss:$0 sm:$0xff] }
 0x393   :  { %1391 = vtanh.f32 %v461_v1 }
 0x39d   :  { %v1392_v7 = vpop.eup %1391 }
 0x39e   :  { %v469_v8 = vmul.f32 %v1392_v7, %v1114_v6  ;;  %v1146_v6 = vld [vmem:[%s1736_s4 + $0x3] ss:$0 sm:$0xff]  ;;  %s1434_s4 = smov [#allocation2]  }
 0x39f   :  { %s1081_s1 = sshll.u32 %s1434_s4, 4  ;;  %s1082_s1 = int_to_ptr.vmem [resolvable:$true] %s1081_s1 }
 0x3a0   :  { %v544_v9 = vmul.f32 1.442695, %v469_v8  ;;  %v548_v10 = vsel %vm51_vm1, %v469_v8, 0.0  ;;  %s1407_s7 = scalar_lea.vmem %s1082_s1, 128  ;;  %p1412_p1 = scmp.lt.s32.totalorder %s1082_s1, %s1082_s1 }
 0x3a1   :  { %549 = vadd.xlane.f32.xlu0 %v548_v10  ;;  %p1408_p0 = scmp.ne.s32.totalorder %s1082_s1, %s1407_s7  ;;  %p1413_p2 = scmp.lt.s32.totalorder %s1407_s7, %s1407_s7 }
 0x3a2   :  { %1393 = vpow2.f32 %v544_v9 }
 0x3a3   :  { %p1414_p3 = por %p1413_p2, %p1412_p1 }
 0x3a5   :  { %p1415_p4 = pnand %p1414_p3, %p1408_p0 }
 0x3ac   :  { %v1394_v12 = vpop.eup %1393 }
 0x3ad   :  { %v546_v14 = vmul.f32 %v1394_v12, %v287_v41 }
 0x3af   :  { %v547_v15 = vadd.f32 %v546_v14, %v541_v13 }
 0x3b1   :  { %1266 = vmatmul.mubr.msk.f32.vlgmr.msra.gmra.mrb[6].mxu0 %vm51_vm1, %v547_v15 }
 0x3b2   :  { %1287 = vmatprep.mubr.msk.f32.mxu0 %vm1432_vm0, %v1433_v4  ;;  %1360 = vmatpush3.bf16.msra.mxu0 %v1359_v23 }
 0x3b3   :  { %1361 = vmatprep.subr.bf16.mxu0 %v1431_v2 }
 0x3b6   :  { %1363 = vmatpush3.bf16.msra.mxu0 %v1362_v27 }
 0x3b7   :  { %1367 = vmatprep.subr.bf16.mxu0 %v1431_v2 }
 0x484   :  { %v642_v29 = vpop.f32.mrb[6].mxu0 }
 0x485   :  { %v643_v30 = vadd.f32 %v1127_v28, %v642_v29  ;;  %v1267_v31 = vpop.f32.mrb[7].mxu0 }
 0x487   :  { %1395 = vtanh.f32 %v643_v30 }
 0x491   :  { %v1396_v32 = vpop.eup %1395 }
 0x492   :  { %1277 = vmatmul.mubr.msk.f32.vlgmr.msra.gmra.mrb[6].mxu1 %vm130_vm2, %v1396_v32  ;;  %1288 = vmatmul.mubr.msk.f32.vlgmr.msra.gmra.mrb[8].mxu0 %vm130_vm2, %v1396_v32 }
 0x493   :  { %1294 = vmatprep.mubr.msk.f32.mxu1 %vm1432_vm0, %v1433_v4  ;;  %1305 = vmatprep.mubr.msk.f32.mxu0 %vm1432_vm0, %v1433_v4 }
 0x494   :  { %1366 = vmatpush3.bf16.msra.mxu1 %v1365_v35  ;;  %1369 = vmatpush3.bf16.msra.mxu0 %v1368_v55 }
 0x495   :  { %1373 = vmatprep.subr.bf16.mxu1 %v1431_v2  ;;  %1370 = vmatprep.subr.bf16.mxu0 %v1431_v2 }
 0x565   :  { %v720_v37 = vpop.f32.mrb[6].mxu1  ;;  %v800_v38 = vpop.f32.mrb[8].mxu0 }
 0x566   :  { %v721_v39 = vadd.f32 %v1129_v36, %v720_v37  ;;  %v1278_v40 = vpop.f32.mrb[7].mxu1  ;;  %v1289_v41 = vpop.f32.mrb[9].mxu0  ;;  %v801_v49 = vadd.f32 %v1132_v47, %v800_v38 }
 0x568   :  { %1397 = vtanh.f32 %v721_v39 }
 0x572   :  { %v1398_v43 = vpop.eup %1397 }
 0x573   :  { %v729_v44 = vmul.f32 %v1398_v43, %v1131_v42 }
 0x575   :  { %v808_v45 = vsel %vm51_vm1, %v729_v44, 0.0  ;;  %v804_v46 = vmul.f32 1.442695, %v729_v44 }
 0x576   :  { %809 = vadd.xlane.f32.xlu1 %v808_v45 }
 0x577   :  { %1399 = vpow2.f32 %v804_v46 }
 0x581   :  { %v1400_v48 = vpop.eup %1399 }
 0x582   :  { %v806_v50 = vmul.f32 %v1400_v48, %v547_v15 }
 0x584   :  { %v807_v51 = vadd.f32 %v806_v50, %v801_v49 }
 0x586   :  { %1295 = vmatmul.mubr.msk.f32.vlgmr.msra.gmra.mrb[8].mxu1 %vm51_vm1, %v807_v51 }
 0x587   :  { %1316 = vmatprep.mubr.msk.f32.mxu1 %vm1432_vm0, %v1433_v4  ;;  %v1138_v4 = vld [vmem:[%s1735_s3 + $0x70] sm:$0xff]  ;;  %1375 = vmatpush3.bf16.msra.mxu1 %v1374_v58 }
 0x588   :  { %v1371_v61 = vpack.c.bf16 %v1139_v57, %v1138_v4  ;;  %1376 = vmatprep.subr.bf16.mxu1 %v1431_v2 }
 0x58a   :  { %1372 = vmatpush3.bf16.msra.mxu0 %v1371_v61 }
 0x58b   :  { %1378 = vmatpush3.bf16.msra.mxu1 %v1377_v62 }
 0x659   :  { %v902_v0 = vpop.f32.mrb[8].mxu1 }
 0x65a   :  { %v903_v1 = vadd.f32 %v1144_v63, %v902_v0  ;;  %v1296_v3 = vpop.f32.mrb[9].mxu1 }
 0x65c   :  { %1401 = vtanh.f32 %v903_v1 }
 0x666   :  { %v1402_v5 = vpop.eup %1401 }
 0x667   :  { %1306 = vmatmul.mubr.msk.f32.vlgmr.msra.gmra.mrb[10].mxu0 %vm130_vm2, %v1402_v5  ;;  %1317 = vmatmul.mubr.msk.f32.vlgmr.msra.gmra.mrb[10].mxu1 %vm130_vm2, %v1402_v5 }
 0x73a   :  { %v980_v2 = vpop.f32.mrb[10].mxu0  ;;  %v1060_v7 = vpop.f32.mrb[10].mxu1 }
 0x73b   :  { %v981_v8 = vadd.f32 %v1146_v6, %v980_v2  ;;  %v1307_v9 = vpop.f32.mrb[11].mxu0  ;;  %v1318_v10 = vpop.f32.mrb[11].mxu1  ;;  %v1061_v18 = vadd.f32 %v1149_v16, %v1060_v7 }
 0x73d   :  { %1403 = vtanh.f32 %v981_v8 }
 0x747   :  { %v1404_v12 = vpop.eup %1403 }
 0x748   :  { %v989_v13 = vmul.f32 %v1404_v12, %v1148_v11 }
 0x74a   :  { %v1064_v14 = vmul.f32 1.442695, %v989_v13  ;;  %v1068_v15 = vsel %vm51_vm1, %v989_v13, 0.0 }
 0x74b   :  { %1069 = vadd.xlane.f32.xlu1 %v1068_v15 }
 0x74c   :  { %1405 = vpow2.f32 %v1064_v14 }
 0x756   :  { %v1406_v17 = vpop.eup %1405 }
 0x757   :  { %v1066_v19 = vmul.f32 %v1406_v17, %v807_v51 }
 0x759   :  { %v1067_v20 = vadd.f32 %v1066_v19, %v1061_v18 }
 0x75b   :  { %1072 = vst.msk [vmem:[#allocation2] sm:$0xff] %vm51_vm1, %v1067_v20 }
 0x75c   :  { %1418 = shalt.err (!%p1415_p4)
}
 0x75d   :  { %s1419_s6 = scalar_lea.hbm %s1740_s8, 128 }
 0x75e   :  { %p1420_p5 = scmp.ne.s32.totalorder %s1740_s8, %s1419_s6  ;;  %p1423_p6 = scmp.lt.u32.totalorder %s1419_s6, %s1740_s8 }
 0x760   :  { %p1425_p7 = pnand %p1423_p6, %p1420_p5 }
 0x762   :  { %1428 = shalt.err (!%p1425_p7)
}
 0x763   :  { %1084 = dma.vmem_to_hbm [thread:$0]  %s1082_s1, 128, %s1740_s8, [#allocation3]   ;;  %v290_v21 = vpop.xlane.xlu0 %289  ;;  %v810_v23 = vpop.xlane.xlu1 %809  ;;  %vm1073_vm3 = vcmask 7168  }
 0x767   :  { %v550_v22 = vpop.xlane.xlu0 %549 }
 0x768   :  { %v551_v24 = vadd.f32 %v550_v22, %v290_v21 }
 0x76a   :  { %v811_v25 = vadd.f32 %v810_v23, %v551_v24 }
 0x7d8   :  { %v1070_v26 = vpop.xlane.xlu1 %1069 }
 0x7d9   :  { %v1071_v27 = vadd.f32 %v1070_v26, %v811_v25 }
 0x7db   :  { %1074 = vst.msk [vmem:[%s1741_s9] sm:$0xff] %vm1073_vm3, %v1071_v27 }
 0x7dc   :  { %1429 = dma.done.wait [#allocation3], 128  }
 0x7dd   :  { %1430 = vsyncadd [#allocation3], 4294967168 }
 0x7de   :  { %1092 = vsyncpa [#allocation3], 1 }

</bundles_post_ra>
